<compile_context>
chip_gen: v6e
topology: v6e:2x2x1
jax: 0.10.0
libtpu: 0.0.40
codegen_flags: <defaults>
</compile_context>

<pallas_src>
import math
import functools

import jax
import jax.numpy as jnp
from jax.experimental import pallas as pl
from jax.experimental.pallas import tpu as pltpu


def _vmem_limit_bytes():
    """Generation-aware scoped-VMEM limit: physical minus ~16 MiB headroom, capped at 100 MiB."""
    cap = 64 * 1024 * 1024
    try:
        info = pltpu.get_tpu_info()
        cap = int(getattr(info, "vmem_capacity_bytes", cap) or cap)
    except Exception:
        pass
    return int(min(max(cap - (16 << 20), 32 << 20), 100 << 20))


VMEM_LIMIT = _vmem_limit_bytes()


def _pick_tile(dim, target, mult):
    """Largest tile <= target that divides dim and is a multiple of `mult`; else full dim."""
    if dim <= target:
        return dim
    t = (target // mult) * mult
    while t >= mult:
        if dim % t == 0:
            return t
        t -= mult
    return dim


# --------------- fused RMSNorm + matmul (+ReLU), norm cached in VMEM ---------------- #

def _ln_mm_kernel(x_ref, g_ref, w_ref, o_ref, xn_scr, *, relu):
    @pl.when(pl.program_id(1) == 0)
    def _():
        x = x_ref[...].astype(jnp.float32)                    # (tm, D)
        var = jnp.mean(x * x, axis=-1, keepdims=True)
        xn_scr[...] = (x * jax.lax.rsqrt(var + 1e-6) * g_ref[...]).astype(xn_scr.dtype)

    y = jnp.dot(xn_scr[...], w_ref[...], preferred_element_type=jnp.float32)
    if relu:
        y = jnp.maximum(y, 0.0)
    o_ref[...] = y.astype(o_ref.dtype)


def rmsnorm_matmul(x, gamma, w, *, relu=False, out_dtype=jnp.bfloat16):
    M, D = x.shape
    _, N = w.shape
    tm = _pick_tile(M, 512, 16)
    tn = _pick_tile(N, 512, 128)
    return pl.pallas_call(
        functools.partial(_ln_mm_kernel, relu=relu),
        grid=(M // tm, N // tn),
        in_specs=[pl.BlockSpec((tm, D), lambda i, j: (i, 0)),
                  pl.BlockSpec((1, D), lambda i, j: (0, 0)),
                  pl.BlockSpec((D, tn), lambda i, j: (0, j))],
        out_specs=pl.BlockSpec((tm, tn), lambda i, j: (i, j)),
        out_shape=jax.ShapeDtypeStruct((M, N), out_dtype),
        scratch_shapes=[pltpu.VMEM((tm, D), jnp.bfloat16)],
        compiler_params=pltpu.CompilerParams(
            dimension_semantics=("parallel", "arbitrary"),   # scratch carried across j
            vmem_limit_bytes=VMEM_LIMIT),
    )(x, gamma.reshape(1, D), w)


# ---------------------------- tiled matmul (K-reduced) ------------------------------ #

def _mm_kernel(a_ref, w_ref, o_ref, acc_ref):
    @pl.when(pl.program_id(2) == 0)
    def _():
        acc_ref[...] = jnp.zeros_like(acc_ref)
    acc_ref[...] += jnp.dot(a_ref[...], w_ref[...], preferred_element_type=jnp.float32)

    @pl.when(pl.program_id(2) == pl.num_programs(2) - 1)
    def _():
        o_ref[...] = acc_ref[...].astype(o_ref.dtype)


def matmul(a, w, *, out_dtype=jnp.bfloat16):
    M, K = a.shape
    _, N = w.shape
    tm = _pick_tile(M, 512, 16)
    tn = _pick_tile(N, 512, 128)
    tk = _pick_tile(K, 512, 128)
    return pl.pallas_call(
        _mm_kernel,
        grid=(M // tm, N // tn, K // tk),
        in_specs=[pl.BlockSpec((tm, tk), lambda i, j, k: (i, k)),
                  pl.BlockSpec((tk, tn), lambda i, j, k: (k, j))],
        out_specs=pl.BlockSpec((tm, tn), lambda i, j, k: (i, j)),
        out_shape=jax.ShapeDtypeStruct((M, N), out_dtype),
        scratch_shapes=[pltpu.VMEM((tm, tn), jnp.float32)],
        compiler_params=pltpu.CompilerParams(
            dimension_semantics=("parallel", "parallel", "arbitrary"),
            vmem_limit_bytes=VMEM_LIMIT),
    )(a, w)


# --------------------- tiled matmul with fused residual epilogue -------------------- #

def _mm_res_kernel(a_ref, w_ref, r_ref, o_ref, acc_ref):
    @pl.when(pl.program_id(2) == 0)
    def _():
        acc_ref[...] = jnp.zeros_like(acc_ref)
    acc_ref[...] += jnp.dot(a_ref[...], w_ref[...], preferred_element_type=jnp.float32)

    @pl.when(pl.program_id(2) == pl.num_programs(2) - 1)
    def _():
        o_ref[...] = (acc_ref[...] + r_ref[...].astype(jnp.float32)).astype(o_ref.dtype)


def matmul_add_residual(a, w, residual, *, out_dtype=jnp.bfloat16):
    M, K = a.shape
    _, N = w.shape
    tm = _pick_tile(M, 512, 16)
    tn = _pick_tile(N, 512, 128)
    tk = _pick_tile(K, 512, 128)
    return pl.pallas_call(
        _mm_res_kernel,
        grid=(M // tm, N // tn, K // tk),
        in_specs=[pl.BlockSpec((tm, tk), lambda i, j, k: (i, k)),
                  pl.BlockSpec((tk, tn), lambda i, j, k: (k, j)),
                  pl.BlockSpec((tm, tn), lambda i, j, k: (i, j))],
        out_specs=pl.BlockSpec((tm, tn), lambda i, j, k: (i, j)),
        out_shape=jax.ShapeDtypeStruct((M, N), out_dtype),
        scratch_shapes=[pltpu.VMEM((tm, tn), jnp.float32)],
        compiler_params=pltpu.CompilerParams(
            dimension_semantics=("parallel", "parallel", "arbitrary"),
            vmem_limit_bytes=VMEM_LIMIT),
    )(a, w, residual)


# --------- attention (all heads per step) + fused output projection + residual ------ #

def _attn_proj_kernel(q_ref, k_ref, v_ref, w_ref, r_ref, o_ref, attn_scr,
                      *, causal, scale, n_heads, d_head):
    tq = q_ref.shape[1]
    tk = k_ref.shape[1]

    q = q_ref[0] * scale                         # (tq, HD) bf16; scale applied once
    k = k_ref[0]                                 # (tk, HD) bf16
    v = v_ref[0]

    if causal:
        q_off = pl.program_id(1) * tq
        row = jax.lax.broadcasted_iota(jnp.int32, (tq, tk), 0) + q_off
        col = jax.lax.broadcasted_iota(jnp.int32, (tq, tk), 1)
        keep = col <= row

    for h in range(n_heads):                     # static loop over lane slices
        sl = slice(h * d_head, (h + 1) * d_head)
        qh, kh, vh = q[:, sl], k[:, sl], v[:, sl]
        s = jax.lax.dot_general(qh, kh, (((1,), (1,)), ((), ())),
                                preferred_element_type=jnp.float32)
        if causal:
            s = jnp.where(keep, s, -1e30)        # scores stay fp32
        m = jnp.max(s, axis=-1, keepdims=True)
        p = jnp.exp(s - m)
        p = p * pl.reciprocal(jnp.sum(p, axis=-1, keepdims=True), approx=True)
        pv = jnp.dot(p.astype(vh.dtype), vh, preferred_element_type=jnp.float32)
        attn_scr[:, sl] = pv.astype(attn_scr.dtype)   # write head slice, no concat

    # fused output projection + residual add (lane-dense (tq, D) store)
    proj = jnp.dot(attn_scr[...], w_ref[...], preferred_element_type=jnp.float32)
    o_ref[0] = (proj + r_ref[0].astype(jnp.float32)).astype(o_ref.dtype)


def attention_block(q_src, kv_src, q_col, k_col, v_col, w_o, residual,
                    *, causal, n_heads, d_head):
    """q_src[..., q_col*HD:(q_col+1)*HD] attends over kv_src columns k_col / v_col;
    the result is projected by w_o and added to `residual` (all inside one kernel)."""
    B, Tq, _ = q_src.shape
    _, Tk, _ = kv_src.shape
    HD = n_heads * d_head
    D = w_o.shape[1]
    scale = 1.0 / math.sqrt(d_head)
    tq = _pick_tile(Tq, 256, 8)

    return pl.pallas_call(
        functools.partial(_attn_proj_kernel, causal=causal, scale=scale,
                          n_heads=n_heads, d_head=d_head),
        grid=(B, Tq // tq),
        in_specs=[pl.BlockSpec((1, tq, HD), lambda b, qi: (b, qi, q_col)),
                  pl.BlockSpec((1, Tk, HD), lambda b, qi: (b, 0, k_col)),
                  pl.BlockSpec((1, Tk, HD), lambda b, qi: (b, 0, v_col)),
                  pl.BlockSpec((HD, D), lambda b, qi: (0, 0)),
                  pl.BlockSpec((1, tq, D), lambda b, qi: (b, qi, 0))],
        out_specs=pl.BlockSpec((1, tq, D), lambda b, qi: (b, qi, 0)),
        out_shape=jax.ShapeDtypeStruct((B, Tq, D), residual.dtype),
        scratch_shapes=[pltpu.VMEM((tq, HD), jnp.bfloat16)],
        compiler_params=pltpu.CompilerParams(
            dimension_semantics=("parallel", "parallel"),
            vmem_limit_bytes=VMEM_LIMIT),
    )(q_src, kv_src, kv_src, w_o, residual)


# --------- fused final RMSNorm + lm_head + vocab-chunked online-LSE CE --------------- #

def _lmhead_ce_kernel(x_ref, g_ref, w_ref, lbl_ref, logits_ref, nll_ref,
                      xn_scr, m_scr, l_scr, p_scr):
    j = pl.program_id(1)

    @pl.when(j == 0)
    def _():
        x = x_ref[...].astype(jnp.float32)                    # (tm, D)
        var = jnp.mean(x * x, axis=-1, keepdims=True)
        xn_scr[...] = (x * jax.lax.rsqrt(var + 1e-6) * g_ref[...]).astype(xn_scr.dtype)
        m_scr[...] = jnp.full_like(m_scr, -1e30)
        l_scr[...] = jnp.zeros_like(l_scr)
        p_scr[...] = jnp.zeros_like(p_scr)

    logits = jnp.dot(xn_scr[...], w_ref[...], preferred_element_type=jnp.float32)  # (tm, tv)
    logits_ref[...] = logits.astype(logits_ref.dtype)          # streamed out as bf16

    # online logsumexp over vocab chunks (fp32)
    m_new = jnp.maximum(m_scr[...], jnp.max(logits, axis=-1, keepdims=True))
    alpha = jnp.exp(m_scr[...] - m_new)
    l_scr[...] = alpha * l_scr[...] + jnp.sum(jnp.exp(logits - m_new), axis=-1, keepdims=True)
    m_scr[...] = m_new

    # gather the target logit via an in-chunk one-hot (labels == -100 never match)
    tv = logits.shape[1]
    col = jax.lax.broadcasted_iota(jnp.int32, logits.shape, 1) + j * tv
    onehot = (col == lbl_ref[...]).astype(jnp.float32)
    p_scr[...] += jnp.sum(logits * onehot, axis=-1, keepdims=True)

    @pl.when(j == pl.num_programs(1) - 1)
    def _():
        nll_ref[...] = m_scr[...] + jnp.log(l_scr[...]) - p_scr[...]


def rmsnorm_lmhead_ce(x, gamma, w, labels_flat, *, logits_dtype=jnp.bfloat16):
    M, D = x.shape
    _, V = w.shape
    tm = _pick_tile(M, 256, 16)
    tv = _pick_tile(V, 512, 256)                 # prefer MXU-width multiples of 256
    if tv == V and V > 512:
        tv = _pick_tile(V, 512, 128)
    labels2 = labels_flat.reshape(M, 1).astype(jnp.int32)
    logits, nll = pl.pallas_call(
        _lmhead_ce_kernel,
        grid=(M // tm, V // tv),
        in_specs=[pl.BlockSpec((tm, D), lambda i, j: (i, 0)),
                  pl.BlockSpec((1, D), lambda i, j: (0, 0)),
                  pl.BlockSpec((D, tv), lambda i, j: (0, j)),
                  pl.BlockSpec((tm, 1), lambda i, j: (i, 0))],
        out_specs=[pl.BlockSpec((tm, tv), lambda i, j: (i, j)),
                   pl.BlockSpec((tm, 1), lambda i, j: (i, 0))],
        out_shape=[jax.ShapeDtypeStruct((M, V), logits_dtype),
                   jax.ShapeDtypeStruct((M, 1), jnp.float32)],
        scratch_shapes=[pltpu.VMEM((tm, D), jnp.bfloat16),
                        pltpu.VMEM((tm, 1), jnp.float32),
                        pltpu.VMEM((tm, 1), jnp.float32),
                        pltpu.VMEM((tm, 1), jnp.float32)],
        compiler_params=pltpu.CompilerParams(
            dimension_semantics=("parallel", "arbitrary"),   # scratch carried across vocab axis
            vmem_limit_bytes=VMEM_LIMIT),
    )(x, gamma.reshape(1, D), w, labels2)
    return logits, nll


# ---------------------------------- glue (JAX) --------------------------------------- #

def shift_right(labels, decoder_start_token_id, pad_token_id):
    shifted = jnp.zeros_like(labels)
    shifted = shifted.at[..., 1:].set(labels[..., :-1])
    shifted = shifted.at[..., 0].set(decoder_start_token_id)
    shifted = jnp.where(shifted == -100, pad_token_id, shifted)
    return shifted


def init_params(key, vocab, d_model, d_ff, n_heads, d_kv):
    HD = n_heads * d_kv
    ks = jax.random.split(key, 12)
    s = 0.02
    bf = jnp.bfloat16

    def w(k, shape):
        return jax.random.normal(k, shape, jnp.float32) * s

    wq, wk, wv = w(ks[1], (d_model, HD)), w(ks[2], (d_model, HD)), w(ks[3], (d_model, HD))
    ck, cv = w(ks[6], (d_model, HD)), w(ks[7], (d_model, HD))
    return dict(
        embedding=w(ks[0], (vocab, d_model)),
        ln_self=jnp.ones((d_model,), jnp.float32),
        w_qkv=jnp.concatenate([wq, wk, wv], axis=1).astype(bf),   # fused QKV weight
        wo=w(ks[4], (HD, d_model)).astype(bf),
        ln_cross=jnp.ones((d_model,), jnp.float32),
        cq=w(ks[5], (d_model, HD)).astype(bf),
        w_ckv=jnp.concatenate([ck, cv], axis=1).astype(bf),       # fused cross K/V weight
        co=w(ks[8], (HD, d_model)).astype(bf),
        ln_ff=jnp.ones((d_model,), jnp.float32),
        wi=w(ks[9], (d_model, d_ff)).astype(bf),
        wof=w(ks[10], (d_ff, d_model)).astype(bf),
        ln_final=jnp.ones((d_model,), jnp.float32),
        lm_head=w(ks[11], (d_model, vocab)).astype(bf),
    )


def decoder_with_head_forward(params, hidden_states, labels=None, decoder_input_ids=None,
                              n_heads=4, d_kv=32,
                              decoder_start_token_id=0, pad_token_id=0):
    """Mirrors DecoderWithHead.forward: shift labels -> decoder -> lm_head -> CE loss."""
    B, S_enc, D = hidden_states.shape
    HD = n_heads * d_kv

    if labels is not None and decoder_input_ids is None:
        decoder_input_ids = shift_right(labels, decoder_start_token_id, pad_token_id)
    _, T = decoder_input_ids.shape
    M = B * T

    # shared embedding lookup (dynamic token-id gather kept in plain JAX)
    x = params["embedding"][decoder_input_ids].astype(jnp.bfloat16)       # (B, T, D) bf16 residual
    x2 = x.reshape(M, D)
    enc2 = hidden_states.reshape(B * S_enc, D).astype(jnp.bfloat16)

    # --- causal self-attention block: fused RMSNorm+QKV, attention+out-proj+residual fused ---
    qkv = rmsnorm_matmul(x2, params["ln_self"], params["w_qkv"]).reshape(B, T, 3 * HD)
    x = attention_block(qkv, qkv, 0, 1, 2, params["wo"], x,
                        causal=True, n_heads=n_heads, d_head=d_kv)        # (B, T, D) bf16
    x2 = x.reshape(M, D)

    # --- cross-attention block (queries from decoder, K/V from encoder hidden_states) ---
    q = rmsnorm_matmul(x2, params["ln_cross"], params["cq"]).reshape(B, T, HD)
    kv = matmul(enc2, params["w_ckv"]).reshape(B, S_enc, 2 * HD)
    x = attention_block(q, kv, 0, 0, 1, params["co"], x,
                        causal=False, n_heads=n_heads, d_head=d_kv)
    x2 = x.reshape(M, D)

    # --- feed-forward block (RMSNorm + ReLU fused into first matmul, residual fused) ---
    hff = rmsnorm_matmul(x2, params["ln_ff"], params["wi"], relu=True)
    x2 = matmul_add_residual(hff, params["wof"], x2)                      # bf16 residual stream

    # --- final RMSNorm + lm_head + vocab-chunked cross entropy in one kernel ---
    lbl_flat = (labels.reshape(-1).astype(jnp.int32) if labels is not None
                else jnp.full((M,), -100, jnp.int32))
    logits, nll = rmsnorm_lmhead_ce(x2, params["ln_final"], params["lm_head"], lbl_flat)

    loss = None
    if labels is not None:
        valid = (lbl_flat != -100).astype(jnp.float32)
        # mean over non-ignored tokens (ignore_index=-100); NaN if all ignored, same as torch
        loss = jnp.sum(nll[:, 0] * valid) / jnp.sum(valid)

    # TODO(synk): past_key_values / attentions / hidden-state caches of Seq2SeqLMOutput are
    # HF bookkeeping, not compute — only (loss, logits) are produced here.
    return loss, logits.reshape(B, T, -1)


# ------------------------------------- main ------------------------------------------ #

if __name__ == "__main__":
    B, T, S_enc = 2, 16, 16
    D, D_FF, H, DK, VOCAB = 128, 256, 4, 32, 512

    key = jax.random.PRNGKey(0)
    k_param, k_enc, k_lbl = jax.random.split(key, 3)

    params = init_params(k_param, VOCAB, D, D_FF, H, DK)

    # encoder hidden states fed to the decoder's cross-attention
    hidden_states = jax.random.normal(k_enc, (B, S_enc, D), jnp.float32)

    # labels with a couple of ignored (-100) positions to exercise ignore_index
    labels = jax.random.randint(k_lbl, (B, T), 0, VOCAB, dtype=jnp.int32)
    labels = labels.at[0, -1].set(-100)
    labels = labels.at[1, -2].set(-100)

    loss, logits = decoder_with_head_forward(params, hidden_states, labels=labels,
                                             n_heads=H, d_kv=DK)
    jax.block_until_ready((loss, logits))
    assert logits.shape == (B, T, VOCAB)
    assert bool(jnp.isfinite(loss))
    print("KERNEL_OK")
</pallas_src>

<mosaic_0001>
module attributes {stable_mosaic.version = 11 : i64} {
  func.func @_ln_mm_kernel(%arg0: i32, %arg1: i32, %arg2: memref<32x128xbf16, #tpu.memory_space<vmem>>, %arg3: memref<1x128xf32, #tpu.memory_space<vmem>>, %arg4: memref<128x384xbf16, #tpu.memory_space<vmem>>, %arg5: memref<32x384xbf16, #tpu.memory_space<vmem>>, %arg6: memref<32x128xbf16, #tpu.memory_space<vmem>>) attributes {dimension_semantics = [#tpu.dimension_semantics<parallel>, #tpu.dimension_semantics<arbitrary>], iteration_bounds = array<i64: 1, 1>, scalar_prefetch = 0 : i64, scratch_operands = 1 : i64, tpu.core_type = #tpu.core_type<tc>, window_params = [{transform_indices = @transform_0, window_bounds = array<i64: 32, 128>}, {pipeline_mode = #tpu.pipeline_mode<synchronous>, transform_indices = @transform_1, window_bounds = array<i64: 1, 128>}, {transform_indices = @transform_2, window_bounds = array<i64: 128, 384>}, {transform_indices = @transform_3, window_bounds = array<i64: 32, 384>}]} {
    %c0_i32 = arith.constant 0 : i32
    %0 = arith.cmpi eq, %arg1, %c0_i32 : i32
    %1 = arith.extui %0 : i1 to i32
    %c0_i32_0 = arith.constant 0 : i32
    %2 = arith.cmpi ne, %1, %c0_i32_0 : i32
    scf.if %2 {
      %c0_6 = arith.constant 0 : index
      %c0_7 = arith.constant 0 : index
      %8 = vector.load %arg2[%c0_6, %c0_7] : memref<32x128xbf16, #tpu.memory_space<vmem>>, vector<32x128xbf16>
      %9 = arith.extf %8 : vector<32x128xbf16> to vector<32x128xf32>
      %10 = arith.mulf %9, %9 : vector<32x128xf32>
      %cst_8 = arith.constant dense<0.000000e+00> : vector<32xf32>
      %11 = vector.multi_reduction <add>, %10, %cst_8 [1] : vector<32x128xf32> to vector<32xf32>
      %12 = vector.shape_cast %11 : vector<32xf32> to vector<32x1xf32>
      %cst_9 = arith.constant 1.280000e+02 : f32
      %13 = vector.broadcast %cst_9 : f32 to vector<32x1xf32>
      %14 = arith.divf %12, %13 : vector<32x1xf32>
      %cst_10 = arith.constant 9.99999997E-7 : f32
      %15 = vector.broadcast %cst_10 : f32 to vector<32x1xf32>
      %16 = arith.addf %14, %15 : vector<32x1xf32>
      %17 = math.rsqrt %16 : vector<32x1xf32>
      %18 = vector.broadcast %17 : vector<32x1xf32> to vector<32x128xf32>
      %19 = arith.mulf %9, %18 : vector<32x128xf32>
      %c0_11 = arith.constant 0 : index
      %c0_12 = arith.constant 0 : index
      %20 = vector.load %arg3[%c0_11, %c0_12] : memref<1x128xf32, #tpu.memory_space<vmem>>, vector<1x128xf32>
      %21 = vector.broadcast %20 : vector<1x128xf32> to vector<32x128xf32>
      %22 = arith.mulf %19, %21 : vector<32x128xf32>
      %23 = arith.truncf %22 : vector<32x128xf32> to vector<32x128xbf16>
      %c0_13 = arith.constant 0 : index
      %c0_14 = arith.constant 0 : index
      %24 = vector.load %arg6[%c0_13, %c0_14] : memref<32x128xbf16, #tpu.memory_space<vmem>>, vector<32x128xbf16>
      tpu.vector_store %arg6[%c0_13, %c0_14], %23 {strides = array<i32>} : memref<32x128xbf16, #tpu.memory_space<vmem>>, vector<32x128xbf16>,
    } else {
    }
    %c0 = arith.constant 0 : index
    %c0_1 = arith.constant 0 : index
    %3 = vector.load %arg6[%c0, %c0_1] : memref<32x128xbf16, #tpu.memory_space<vmem>>, vector<32x128xbf16>
    %c0_2 = arith.constant 0 : index
    %c0_3 = arith.constant 0 : index
    %4 = vector.load %arg4[%c0_2, %c0_3] : memref<128x384xbf16, #tpu.memory_space<vmem>>, vector<128x384xbf16>
    %cst = arith.constant dense<0.000000e+00> : vector<32x384xf32>
    %5 = tpu.matmul %3, %4, %cst {dimension_numbers = #tpu.dot_dimension_numbers<[1], [0], [0], [1], [0, 0, 1, 1], [], []>} : vector<32x128xbf16>, vector<128x384xbf16>, vector<32x384xf32> -> vector<32x384xf32>
    %6 = arith.truncf %5 : vector<32x384xf32> to vector<32x384xbf16>
    %c0_4 = arith.constant 0 : index
    %c0_5 = arith.constant 0 : index
    %7 = vector.load %arg5[%c0_4, %c0_5] : memref<32x384xbf16, #tpu.memory_space<vmem>>, vector<32x384xbf16>
    tpu.vector_store %arg5[%c0_4, %c0_5], %6 {strides = array<i32>} : memref<32x384xbf16, #tpu.memory_space<vmem>>, vector<32x384xbf16>,
    return
  }
  func.func @transform_0(%arg0: i32, %arg1: i32) -> (i32, i32) {
    %c0_i32 = arith.constant 0 : i32
    %c0_i32_0 = arith.constant 0 : i32
    return %arg0, %c0_i32 : i32, i32
  }
  func.func @transform_1(%arg0: i32, %arg1: i32) -> (i32, i32) {
    %c0_i32 = arith.constant 0 : i32
    %c0_i32_0 = arith.constant 0 : i32
    %c0_i32_1 = arith.constant 0 : i32
    return %c0_i32, %c0_i32_0 : i32, i32
  }
  func.func @transform_2(%arg0: i32, %arg1: i32) -> (i32, i32) {
    %c0_i32 = arith.constant 0 : i32
    %c0_i32_0 = arith.constant 0 : i32
    return %c0_i32, %arg1 : i32, i32
  }
  func.func @transform_3(%arg0: i32, %arg1: i32) -> (i32, i32) {
    %c0_i32 = arith.constant 0 : i32
    return %arg0, %arg1 : i32, i32
  }
}

</mosaic_0001>

<bundles_post_ra>
// kernel: tpu_custom_call.1
= control target key start
LH: loop header
LB: loop body
LE: loop exit
PB: predicated region body
PF: predicated region fallthrough
CT: control target
= control target key end

     0   :  { %8 = vsyncpa [#allocation4], 0  ;;  %s743_s0 = inlined_call_operand.hbm [shape: bf16[32,128], index: 0, kind: input, shape index: {}]   ;;  %s744_s1 = inlined_call_operand.vmem [shape: f32[1,128], index: 1, kind: input, shape index: {}]   ;;  %s745_s2 = inlined_call_operand.hbm [shape: bf16[128,384], index: 2, kind: input, shape index: {}]   ;;  %s746_s3 = inlined_call_operand.hbm [shape: bf16[32,384], index: 3, kind: output, shape index: {}]  }
   0x1   :  { %9 = vsyncpa [#allocation7], 0 }
   0x2   :  { %10 = vsyncpa [#allocation5], 0  ;;  %s677_s12 = smov [#allocation3]  }
   0x3   :  { %s16_s13 = sshll.u32 %s677_s12, 4  ;;  %s17_s13 = int_to_ptr.vmem [resolvable:$true] %s16_s13 }
   0x4   :  { %s619_s14 = scalar_lea.vmem %s17_s13, 256  ;;  %p624_p1 = scmp.lt.s32.totalorder %s17_s13, %s17_s13 }
   0x5   :  { %p620_p0 = scmp.ne.s32.totalorder %s17_s13, %s619_s14  ;;  %p625_p2 = scmp.lt.s32.totalorder %s619_s14, %s619_s14 }
   0x7   :  { %p626_p3 = por %p625_p2, %p624_p1 }
   0x9   :  { %p627_p4 = pnand %p626_p3, %p620_p0 }
   0xb   :  { %630 = shalt.err (!%p627_p4)
}
   0xc   :  { %s678_s15 = smov 64   ;;  %s679_s16 = smov 4  }
   0xd   :  { %22 = dma.hbm_to_vmem [thread:$0]  %s743_s0, 256, %s17_s13, [#allocation4], %s678_s15, %s678_s15, %s679_s16  }
   0xe   :  { %s680_s19 = smov [#allocation6]  }
   0xf   :  { %s30_s20 = sshll.u32 %s680_s19, 4  ;;  %s31_s20 = int_to_ptr.vmem [resolvable:$true] %s30_s20 }
  0x10   :  { %s639_s21 = scalar_lea.vmem %s31_s20, 3072  ;;  %p644_p6 = scmp.lt.s32.totalorder %s31_s20, %s31_s20 }
  0x11   :  { %p640_p5 = scmp.ne.s32.totalorder %s31_s20, %s639_s21  ;;  %p645_p7 = scmp.lt.s32.totalorder %s639_s21, %s639_s21 }
  0x13   :  { %p646_p8 = por %p645_p7, %p644_p6 }
  0x15   :  { %p647_p9 = pnand %p646_p8, %p640_p5 }
  0x17   :  { %650 = shalt.err (!%p647_p9)
}
  0x18   :  { %s681_s22 = smov 192   ;;  %s682_s23 = smov 12  }
  0x19   :  { %36 = dma.hbm_to_vmem [thread:$0]  %s745_s2, 3072, %s31_s20, [#allocation7], %s681_s22, %s681_s22, %s682_s23  }
  0x1a   :  { %671 = dma.done.wait [#allocation4], 256  }
  0x1b   :  { %672 = vsyncadd [#allocation4], 4294967040 }
  0x1c   :  { %673 = dma.done.wait [#allocation7], 3072  }
  0x1d   :  { %674 = vsyncadd [#allocation7], 4294964224  ;;  %v512_v0 = vld [vmem:[#allocation3] sm:$0xff]   ;;  %v529_v1 = vld [vmem:[#allocation3 + $0x8] sm:$0xff]   ;;  %v683_v34 = vmov 0  }
  0x1e   :  { %v714_v2 = vunpack.c.l.bf16 %v512_v0  ;;  %v716_v3 = vunpack.c.l.bf16 %v529_v1  ;;  %v718_v4 = vunpack.c.h.bf16 %v512_v0  ;;  %v720_v5 = vunpack.c.h.bf16 %v529_v1  ;;  %v569_v10 = vld [vmem:[#allocation6 + $0xac] ss:$12 sps:$4 sm:$0xff]   ;;  %v571_v11 = vld [vmem:[#allocation6 + $0xa8] ss:$12 sps:$4 sm:$0xff]   ;;  %v572_v12 = vld [vmem:[#allocation6 + $0xb0] ss:$12 sps:$4 sm:$0xff]   ;;  %324 = vmatprep.mubr.bf16.mxu0 %v683_v34 }
  0x1f   :  { %292 = vmatprep.subr.bf16.mxu0 %v569_v10  ;;  %541 = vmatprep.subr.bf16.mxu1 %v572_v12  ;;  %v573_v13 = vld [vmem:[#allocation6 + $0x94] ss:$12 sps:$4 sm:$0xff]   ;;  %v575_v14 = vld [vmem:[#allocation6 + $0x90] ss:$12 sps:$4 sm:$0xff]   ;;  %v576_v15 = vld [vmem:[#allocation6 + $0x98] ss:$12 sps:$4 sm:$0xff]  }
  0x20   :  { %v56_v6 = vmul.f32 %v714_v2, %v714_v2  ;;  %v58_v7 = vmul.f32 %v716_v3, %v716_v3  ;;  %v57_v8 = vmul.f32 %v718_v4, %v718_v4  ;;  %v59_v9 = vmul.f32 %v720_v5, %v720_v5  ;;  %293 = vmatpush1.bf16.msra.mxu0 %v571_v11  ;;  %v577_v16 = vld [vmem:[#allocation6 + $0x7c] ss:$12 sps:$4 sm:$0xff]   ;;  %v579_v17 = vld [vmem:[#allocation6 + $0x78] ss:$12 sps:$4 sm:$0xff]   ;;  %v580_v18 = vld [vmem:[#allocation6 + $0x80] ss:$12 sps:$4 sm:$0xff]  }
  0x21   :  { %542 = vmatpush3.bf16.msra.mxu1 %v572_v12  ;;  %294 = vmatprep.subr.bf16.mxu0 %v573_v13  ;;  %v581_v19 = vld [vmem:[#allocation6 + $0x64] ss:$12 sps:$4 sm:$0xff]   ;;  %v583_v20 = vld [vmem:[#allocation6 + $0x60] ss:$12 sps:$4 sm:$0xff]   ;;  %v584_v21 = vld [vmem:[#allocation6 + $0x68] ss:$12 sps:$4 sm:$0xff]  }
  0x22   :  { %60 = vadd.xlane.f32.xlu0 %v56_v6  ;;  %64 = vadd.xlane.f32.xlu1 %v58_v7  ;;  %v585_v22 = vld [vmem:[#allocation6 + $0x4c] ss:$12 sps:$4 sm:$0xff]   ;;  %v587_v23 = vld [vmem:[#allocation6 + $0x48] ss:$12 sps:$4 sm:$0xff]   ;;  %v588_v24 = vld [vmem:[#allocation6 + $0x50] ss:$12 sps:$4 sm:$0xff]  }
  0x23   :  { %543 = vmatprep.subr.bf16.mxu1 %v576_v15  ;;  %v589_v25 = vld [vmem:[#allocation6 + $0x34] ss:$12 sps:$4 sm:$0xff]   ;;  %v591_v26 = vld [vmem:[#allocation6 + $0x30] ss:$12 sps:$4 sm:$0xff]   ;;  %v592_v27 = vld [vmem:[#allocation6 + $0x38] ss:$12 sps:$4 sm:$0xff]  }
  0x24   :  { %295 = vmatpush1.bf16.msra.mxu0 %v575_v14  ;;  %v593_v28 = vld [vmem:[#allocation6 + $0x1c] ss:$12 sps:$4 sm:$0xff]   ;;  %v595_v29 = vld [vmem:[#allocation6 + $0x18] ss:$12 sps:$4 sm:$0xff]   ;;  %v596_v30 = vld [vmem:[#allocation6 + $0x20] ss:$12 sps:$4 sm:$0xff]  }
  0x25   :  { %544 = vmatpush3.bf16.msra.mxu1 %v576_v15  ;;  %296 = vmatprep.subr.bf16.mxu0 %v577_v16  ;;  %v597_v31 = vld [vmem:[#allocation6 + $0x4] ss:$12 sps:$4 sm:$0xff]   ;;  %v600_v32 = vld [vmem:[#allocation6 + $0x8] ss:$12 sps:$4 sm:$0xff]   ;;  %v599_v33 = vld [vmem:[#allocation6] ss:$12 sps:$4 sm:$0xff]  }
  0x26   :  { %62 = vadd.xlane.f32.xlu0 %v57_v8  ;;  %66 = vadd.xlane.f32.xlu1 %v59_v9  ;;  %v460_v52 = vld [vmem:[%s744_s1] ss:$0 sm:$0xff]  ;;  %s684_s1 = smov [#allocation8]  }
  0x27   :  { %545 = vmatprep.subr.bf16.mxu1 %v580_v18  ;;  %s447_s26 = sshll.u32 %s684_s1, 4  ;;  %s448_s26 = int_to_ptr.vmem [resolvable:$true] %s447_s26 }
  0x28   :  { %297 = vmatpush1.bf16.msra.mxu0 %v579_v17  ;;  %s651_s27 = scalar_lea.vmem %s448_s26, 768  ;;  %p656_p11 = scmp.lt.s32.totalorder %s448_s26, %s448_s26 }
  0x29   :  { %546 = vmatpush3.bf16.msra.mxu1 %v580_v18  ;;  %298 = vmatprep.subr.bf16.mxu0 %v581_v19  ;;  %p652_p10 = scmp.ne.s32.totalorder %s448_s26, %s651_s27  ;;  %p657_p12 = scmp.lt.s32.totalorder %s651_s27, %s651_s27 }
  0x2a   :  { %547 = vmatprep.subr.bf16.mxu1 %v584_v21 }
  0x2b   :  { %p658_p13 = por %p657_p12, %p656_p11 }
  0x2c   :  { %299 = vmatpush1.bf16.msra.mxu0 %v583_v20 }
  0x2d   :  { %548 = vmatpush3.bf16.msra.mxu1 %v584_v21  ;;  %300 = vmatprep.subr.bf16.mxu0 %v585_v22  ;;  %p659_p0 = pnand %p658_p13, %p652_p10 }
  0x2e   :  { %549 = vmatprep.subr.bf16.mxu1 %v588_v24 }
  0x30   :  { %301 = vmatpush1.bf16.msra.mxu0 %v587_v23 }
  0x31   :  { %550 = vmatpush3.bf16.msra.mxu1 %v588_v24  ;;  %302 = vmatprep.subr.bf16.mxu0 %v589_v25 }
  0x32   :  { %551 = vmatprep.subr.bf16.mxu1 %v592_v27 }
  0x34   :  { %303 = vmatpush1.bf16.msra.mxu0 %v591_v26 }
  0x35   :  { %552 = vmatpush3.bf16.msra.mxu1 %v592_v27  ;;  %304 = vmatprep.subr.bf16.mxu0 %v593_v28 }
  0x36   :  { %553 = vmatprep.subr.bf16.mxu1 %v596_v30 }
  0x38   :  { %305 = vmatpush1.bf16.msra.mxu0 %v595_v29 }
  0x39   :  { %554 = vmatpush3.bf16.msra.mxu1 %v596_v30  ;;  %306 = vmatprep.subr.bf16.mxu0 %v597_v31 }
  0x3a   :  { %555 = vmatprep.subr.bf16.mxu1 %v600_v32 }
  0x3c   :  { %307 = vmatpush1.bf16.msra.mxu0 %v599_v33 }
  0x3d   :  { %556 = vmatpush3.bf16.msra.mxu1 %v600_v32 }
  0xab   :  { %v61_v35 = vpop.xlane.xlu0 %60  ;;  %v65_v36 = vpop.xlane.xlu1 %64 }
  0xac   :  { %v69_v37 = vmul.f32 0.0078125, %v61_v35  ;;  %v71_v38 = vmul.f32 0.0078125, %v65_v36 }
  0xae   :  { %v73_v39 = vadd.f32 1e-06, %v69_v37  ;;  %v75_v40 = vadd.f32 1e-06, %v71_v38 }
  0xaf   :  { %v63_v41 = vpop.xlane.xlu0 %62  ;;  %v67_v42 = vpop.xlane.xlu1 %66 }
  0xb0   :  { %603 = vrsqrt.f32 %v73_v39  ;;  %v70_v43 = vmul.f32 0.0078125, %v63_v41  ;;  %v72_v44 = vmul.f32 0.0078125, %v67_v42 }
  0xb1   :  { %605 = vrsqrt.f32 %v75_v40 }
  0xb2   :  { %v74_v45 = vadd.f32 1e-06, %v70_v43  ;;  %v76_v46 = vadd.f32 1e-06, %v72_v44 }
  0xb4   :  { %607 = vrsqrt.f32 %v74_v45 }
  0xb5   :  { %609 = vrsqrt.f32 %v76_v46 }
  0xbd   :  { %v604_v47 = vpop.eup %603 }
  0xbe   :  { %v606_v48 = vpop.eup %605  ;;  %v81_v50 = vmul.f32 %v604_v47, %v714_v2 }
  0xbf   :  { %v83_v49 = vmul.f32 %v606_v48, %v716_v3 }
  0xc0   :  { %v92_v57 = vmul.f32 %v460_v52, %v81_v50 }
  0xc1   :  { %v608_v51 = vpop.eup %607  ;;  %v94_v55 = vmul.f32 %v460_v52, %v83_v49 }
  0xc2   :  { %v610_v53 = vpop.eup %609  ;;  %v82_v54 = vmul.f32 %v608_v51, %v718_v4 }
  0xc3   :  { %v84_v56 = vmul.f32 %v610_v53, %v720_v5 }
  0xc4   :  { %v93_v58 = vmul.f32 %v460_v52, %v82_v54 }
  0xc5   :  { %v95_v59 = vmul.f32 %v460_v52, %v84_v56 }
  0xc6   :  { %v522_v60 = vpack.c.bf16 %v93_v58, %v92_v57 }
  0xc7   :  { %v527_v61 = vpack.c.bf16 %v95_v59, %v94_v55 }
  0xc8   :  { %523 = vst [vmem:[#allocation2] sm:$0xff] %v522_v60  }
  0xc9   :  { %530 = vst [vmem:[#allocation2 + $0x8] sm:$0xff] %v527_v61  }
  0xcf   :  { %v601_v62 = vld [vmem:[#allocation2] sm:$0xff]  }
  0xd0   :  { %v602_v63 = vld [vmem:[#allocation2 + $0x8] sm:$0xff]   ;;  %325 = vmatmul.mubr.bf16.vlgmr.msra.gmra.mxu0 %v601_v62  ;;  %557 = vmatprep.mubr.bf16.mxu1 %v601_v62 }
  0xd1   :  { %558 = vmatmul.mubr.bf16.vlgmr.msra.gmra.mxu1 %v602_v63  ;;  %334 = vmatprep.mubr.bf16.mxu0 %v683_v34 }
  0xd8   :  { %335 = vmatmul.mubr.bf16.gmra.mxu0 %v602_v63 }
 0x190   :  { %v326_v0 = vpop.f32.mrf.mxu0 }
 0x191   :  { %v559_v1 = vpop.f32.mrf.mxu1 }
 0x192   :  { %v508_v2 = vpack.c.bf16 %v559_v1, %v559_v1  ;;  %v328_v3 = vpop.f32.mrf.mxu0 }
 0x193   :  { %v503_v4 = vpack.c.bf16 %v328_v3, %v326_v0  ;;  %v379_v5 = vpop.f32.mrf.mxu1 }
 0x194   :  { %439 = vst [vmem:[#allocation8 + $0x20] sm:$0xf] %v508_v2  ;;  %v504_v6 = vpack.c.bf16 %v379_v5, %v379_v5  ;;  %v330_v7 = vpop.f32.mrf.mxu0 }
 0x195   :  { %434 = vst [vmem:[#allocation8] sm:$0xff] %v503_v4  ;;  %v560_v8 = vpop.f32.mrf.mxu1 }
 0x196   :  { %435 = vst [vmem:[#allocation8 + $0x8] sm:$0xf] %v504_v6  ;;  %v510_v9 = vpack.c.bf16 %v560_v8, %v560_v8  ;;  %v332_v10 = vpop.f32.mrf.mxu0 }
 0x197   :  { %v505_v11 = vpack.c.bf16 %v332_v10, %v330_v7  ;;  %v382_v12 = vpop.f32.mrf.mxu1 }
 0x198   :  { %441 = vst [vmem:[#allocation8 + $0x2c] sm:$0xf] %v510_v9  ;;  %v506_v13 = vpack.c.bf16 %v382_v12, %v382_v12  ;;  %v336_v14 = vpop.f32.mrf.mxu0 }
 0x199   :  { %436 = vst [vmem:[#allocation8 + $0xc] sm:$0xff] %v505_v11 }
 0x19a   :  { %437 = vst [vmem:[#allocation8 + $0x14] sm:$0xf] %v506_v13  ;;  %v338_v15 = vpop.f32.mrf.mxu0 }
 0x19b   :  { %v507_v16 = vpack.c.bf16 %v338_v15, %v336_v14 }
 0x19c   :  { %v340_v17 = vpop.f32.mrf.mxu0 }
 0x19d   :  { %438 = vst [vmem:[#allocation8 + $0x18] sm:$0xff] %v507_v16 }
 0x19e   :  { %v342_v18 = vpop.f32.mrf.mxu0 }
 0x19f   :  { %v509_v19 = vpack.c.bf16 %v342_v18, %v340_v17 }
 0x1a1   :  { %440 = vst [vmem:[#allocation8 + $0x24] sm:$0xff] %v509_v19 }
 0x1a2   :  { %662 = shalt.err (!%p659_p0)
}
 0x1a3   :  { %453 = dma.vmem_to_hbm [thread:$0]  %s448_s26, 768, %s746_s3, [#allocation5], %s681_s22, %s681_s22, %s682_s23  }
 0x1a4   :  { %675 = dma.done.wait [#allocation5], 768  }
 0x1a5   :  { %676 = vsyncadd [#allocation5], 4294966528 }
 0x1a6   :  { %457 = vsyncpa [#allocation4], 1 }
 0x1a7   :  { %458 = vsyncpa [#allocation7], 1 }
 0x1a8   :  { %459 = vsyncpa [#allocation5], 1 }

</bundles_post_ra>
